<compile_context>
chip_gen: v7x
topology: tpu7x:2x2x1
jax: 0.10.0
libtpu: 0.0.40
codegen_flags: <defaults>
</compile_context>

<pallas_src>
import functools

import jax
import jax.numpy as jnp
from jax.experimental import pallas as pl
from jax.experimental.pallas import tpu as pltpu


def _cbf_kernel(xt_ref, w1_ref, w2_ref, w3_ref, bpack_ref, w4_ref, b4_ref,
                o_ref, *, mxu_epilogue):
    """One batch tile: xt_ref is (latent_dim, tile_m), o_ref is (1, tile_m)."""
    cdt = w1_ref.dtype                      # MXU operand dtype (bf16 or f32)

    b1 = bpack_ref[:, 0:1]                  # (h_dim, 1) f32 bias columns
    b2 = bpack_ref[:, 1:2]
    b3 = bpack_ref[:, 2:3]

    # Layer 1: (h, latent) @ (latent, tile_m) -> (h, tile_m), f32 accumulate.
    h = jnp.dot(w1_ref[...], xt_ref[...],
                preferred_element_type=jnp.float32) + b1
    h = jnp.maximum(h, 0.0)

    # Layer 2
    h = jnp.dot(w2_ref[...], h.astype(cdt),
                preferred_element_type=jnp.float32) + b2
    h = jnp.maximum(h, 0.0)

    # Layer 3
    h = jnp.dot(w3_ref[...], h.astype(cdt),
                preferred_element_type=jnp.float32) + b3
    h = jnp.maximum(h, 0.0)

    # Layer 4 (h_dim -> 1).
    if mxu_epilogue:
        # (1, h_dim) @ (h_dim, tile_m) on the MXU; already lane-dense (1, tile_m).
        out = jnp.dot(w4_ref[...], h.astype(cdt),
                      preferred_element_type=jnp.float32) + b4_ref[0]
    else:
        # Exact f32 path: VPU multiply + sublane (XLU) reduction.
        out = jnp.sum(h * w4_ref[...], axis=0, keepdims=True) + b4_ref[0]
    o_ref[...] = jnp.tanh(out)


def prepare_barrier_params(params, *, use_bf16=True):
    """Hoisted, once-per-weight-update preprocessing (torch-layout params in).

    Returns (w1c, w2c, w3c, bpack, w4x, b4c) ready for barrier_forward.
    """
    (w1, b1), (w2, b2), (w3, b3), (w4, b4) = params
    cdt = jnp.bfloat16 if use_bf16 else jnp.float32
    h_dim = w1.shape[0]

    w1c = w1.astype(cdt)                                    # (h, latent)
    w2c = w2.astype(cdt)                                    # (h, h)
    w3c = w3.astype(cdt)                                    # (h, h)
    bpack = jnp.stack([b1, b2, b3], axis=1).astype(jnp.float32)   # (h, 3)
    if use_bf16:
        w4x = w4.reshape(1, h_dim).astype(cdt)              # MXU row epilogue
    else:
        w4x = w4.reshape(h_dim, 1).astype(jnp.float32)      # VPU column epilogue
    b4c = b4.reshape(1).astype(jnp.float32)                 # scalar -> SMEM
    return (w1c, w2c, w3c, bpack, w4x, b4c)


@functools.partial(jax.jit, static_argnames=("tile_m",))
def barrier_forward(x, prepped, *, tile_m=512):
    """CBF MLP forward. x: (N, latent_dim) f32, prepped from
    prepare_barrier_params.  Returns (N, 1) float32."""
    w1c, w2c, w3c, bpack, w4x, b4c = prepped
    N, latent_dim = x.shape
    h_dim = w1c.shape[0]
    cdt = w1c.dtype
    mxu_epilogue = (w4x.shape[0] == 1)
    assert tile_m % 128 == 0, "tile_m must be a multiple of 128 (lane width)"

    # Don't exceed the (lane-padded) batch, and keep >= 2 grid tiles whenever
    # possible so v7x's second TensorCore gets work under "parallel".
    tile_m = min(tile_m, 128 * pl.cdiv(N, 128))
    if N > 128:
        tile_m = min(tile_m, 128 * pl.cdiv(N, 256))
    tile_m = max(tile_m, 128)
    n_tiles = pl.cdiv(N, tile_m)

    # Batch on the lane axis; no padding pass — Pallas masks the ragged tail.
    xt = x.T.astype(cdt)                                    # (latent_dim, N)

    # Explicit VMEM budget: single-buffered weights + packed biases + w4 +
    # double-buffered xt/out tiles + f32 activation temporaries (+ slack).
    cb = jnp.dtype(cdt).itemsize
    lat_pad = max(latent_dim, 8)
    w_bytes = (h_dim * lat_pad + 2 * h_dim * h_dim) * cb        # w1, w2, w3 (x1 buf)
    small_bytes = 2 * h_dim * 128 * 4                           # bpack + w4 (lane-padded)
    in_bytes = 2 * lat_pad * tile_m * cb                        # xt tile (x2 bufs)
    out_bytes = 2 * 8 * tile_m * 4                              # (1, tile_m) out (x2 bufs)
    act_bytes = 4 * h_dim * tile_m * 4                          # f32 temporaries
    vmem_limit = int(1.5 * (w_bytes + small_bytes + in_bytes + out_bytes
                            + act_bytes)) + (4 << 20)
    vmem_limit = min(max(vmem_limit, 32 << 20), 100 << 20)

    def rep(shape):                                             # grid-resident, 1 buffer
        return pl.BlockSpec(shape, lambda i: (0, 0),
                            pipeline_mode=pl.Buffered(1))

    kernel = functools.partial(_cbf_kernel, mxu_epilogue=mxu_epilogue)

    out_row = pl.pallas_call(
        kernel,
        out_shape=jax.ShapeDtypeStruct((1, N), jnp.float32),
        grid_spec=pltpu.PrefetchScalarGridSpec(
            num_scalar_prefetch=0,
            grid=(n_tiles,),
            in_specs=[
                pl.BlockSpec((latent_dim, tile_m), lambda i: (0, i)),  # xt tile
                rep((h_dim, latent_dim)),                              # w1
                rep((h_dim, h_dim)),                                   # w2
                rep((h_dim, h_dim)),                                   # w3
                rep((h_dim, 3)),                                       # b1|b2|b3
                rep(w4x.shape),                                        # w4 row/col
                pl.BlockSpec(memory_space=pltpu.MemorySpace.SMEM),     # b4 scalar
            ],
            out_specs=pl.BlockSpec((1, tile_m), lambda i: (0, i)),
        ),
        compiler_params=pltpu.CompilerParams(
            dimension_semantics=("parallel",),
            vmem_limit_bytes=vmem_limit,
        ),
    )(xt, w1c, w2c, w3c, bpack, w4x, b4c)

    # (1, N) row-major == batch order; return (N, 1).
    return out_row.reshape(N, 1)


def init_barrier_params(key, latent_dim, h_dim):
    """torch.nn.Linear-style init, torch layout: w (out,in), b (out,)."""
    dims = [latent_dim, h_dim, h_dim, h_dim, 1]
    params = []
    for i in range(len(dims) - 1):
        fan_in, fan_out = dims[i], dims[i + 1]
        key, kw, kb = jax.random.split(key, 3)
        bound = 1.0 / jnp.sqrt(float(fan_in))
        w = jax.random.uniform(kw, (fan_out, fan_in), jnp.float32, -bound, bound)
        b = jax.random.uniform(kb, (fan_out,), jnp.float32, -bound, bound)
        params.append((w, b))
    return params


def barrier_forward_ref(x, params):
    """Plain-JAX reference (torch-layout params)."""
    (w1, b1), (w2, b2), (w3, b3), (w4, b4) = params
    h = jnp.maximum(x @ w1.T + b1, 0.0)
    h = jnp.maximum(h @ w2.T + b2, 0.0)
    h = jnp.maximum(h @ w3.T + b3, 0.0)
    return jnp.tanh(h @ w4.T + b4)


if __name__ == "__main__":
    # Small shapes consistent with the module (latent_dim=32; h_dim kept small
    # for the self-test — the module default is 1024).
    latent_dim = 32
    h_dim = 128

    key = jax.random.PRNGKey(0)
    key, kx1, kx2 = jax.random.split(key, 3)
    params = init_barrier_params(key, latent_dim, h_dim)

    # 1) bf16 fast path (MXU epilogue), batch spanning 2 grid tiles (exercises
    #    the megacore-parallel split and the lane-dense output path).
    N1 = 512
    x1 = jax.random.normal(kx1, (N1, latent_dim), dtype=jnp.float32)
    prep_bf16 = prepare_barrier_params(params, use_bf16=True)
    out1 = jax.block_until_ready(barrier_forward(x1, prep_bf16))
    ref1 = barrier_forward_ref(x1, params)
    assert out1.shape == (N1, 1)
    assert jnp.allclose(out1, ref1, atol=5e-2, rtol=0.0), "bf16 path mismatch"

    # 2) exact f32 path (VPU epilogue), ragged batch -> masked partial tile.
    N2 = 48
    x2 = jax.random.normal(kx2, (N2, latent_dim), dtype=jnp.float32)
    prep_f32 = prepare_barrier_params(params, use_bf16=False)
    out2 = jax.block_until_ready(barrier_forward(x2, prep_f32))
    ref2 = barrier_forward_ref(x2, params)
    assert out2.shape == (N2, 1)
    assert jnp.allclose(out2, ref2, atol=1e-5, rtol=1e-5), "f32 path mismatch"

    print("KERNEL_OK")
</pallas_src>

<mosaic_0001>
module attributes {stable_mosaic.version = 11 : i64} {
  func.func @_cbf_kernel(%arg0: i32, %arg1: memref<32x256xbf16, #tpu.memory_space<vmem>>, %arg2: memref<128x32xbf16, #tpu.memory_space<vmem>>, %arg3: memref<128x128xbf16, #tpu.memory_space<vmem>>, %arg4: memref<128x128xbf16, #tpu.memory_space<vmem>>, %arg5: memref<128x3xf32, #tpu.memory_space<vmem>>, %arg6: memref<1x128xbf16, #tpu.memory_space<vmem>>, %arg7: memref<1xf32, #tpu.memory_space<smem>>, %arg8: memref<1x256xf32, #tpu.memory_space<vmem>>) attributes {dimension_semantics = [#tpu.dimension_semantics<parallel>], iteration_bounds = array<i64: 2>, scalar_prefetch = 0 : i64, scratch_operands = 0 : i64, tpu.core_type = #tpu.core_type<tc>, window_params = [{transform_indices = @transform_0, window_bounds = array<i64: 32, 256>}, {pipeline_mode = #tpu.pipeline_mode<synchronous>, transform_indices = @transform_1, window_bounds = array<i64: 128, 32>}, {pipeline_mode = #tpu.pipeline_mode<synchronous>, transform_indices = @transform_2, window_bounds = array<i64: 128, 128>}, {pipeline_mode = #tpu.pipeline_mode<synchronous>, transform_indices = @transform_3, window_bounds = array<i64: 128, 128>}, {pipeline_mode = #tpu.pipeline_mode<synchronous>, transform_indices = @transform_4, window_bounds = array<i64: 128, 3>}, {pipeline_mode = #tpu.pipeline_mode<synchronous>, transform_indices = @transform_5, window_bounds = array<i64: 1, 128>}, {transform_indices = @transform_6, window_bounds = array<i64: 1>}, {transform_indices = @transform_7, window_bounds = array<i64: 1, 256>}]} {
    %c0 = arith.constant 0 : index
    %c0_0 = arith.constant 0 : index
    %0 = vector.load %arg5[%c0, %c0_0] : memref<128x3xf32, #tpu.memory_space<vmem>>, vector<128x1xf32>
    %c0_1 = arith.constant 0 : index
    %c1 = arith.constant 1 : index
    %1 = vector.load %arg5[%c0_1, %c1] : memref<128x3xf32, #tpu.memory_space<vmem>>, vector<128x1xf32>
    %c0_2 = arith.constant 0 : index
    %c2 = arith.constant 2 : index
    %2 = vector.load %arg5[%c0_2, %c2] : memref<128x3xf32, #tpu.memory_space<vmem>>, vector<128x1xf32>
    %c0_3 = arith.constant 0 : index
    %c0_4 = arith.constant 0 : index
    %3 = vector.load %arg2[%c0_3, %c0_4] : memref<128x32xbf16, #tpu.memory_space<vmem>>, vector<128x32xbf16>
    %c0_5 = arith.constant 0 : index
    %c0_6 = arith.constant 0 : index
    %4 = vector.load %arg1[%c0_5, %c0_6] : memref<32x256xbf16, #tpu.memory_space<vmem>>, vector<32x256xbf16>
    %cst = arith.constant dense<0.000000e+00> : vector<128x256xf32>
    %5 = tpu.matmul %3, %4, %cst {dimension_numbers = #tpu.dot_dimension_numbers<[1], [0], [0], [1], [0, 0, 1, 1], [], []>} : vector<128x32xbf16>, vector<32x256xbf16>, vector<128x256xf32> -> vector<128x256xf32>
    %6 = vector.broadcast %0 : vector<128x1xf32> to vector<128x256xf32>
    %7 = arith.addf %5, %6 : vector<128x256xf32>
    %cst_7 = arith.constant 0.000000e+00 : f32
    %8 = vector.broadcast %cst_7 : f32 to vector<128x256xf32>
    %9 = arith.maximumf %7, %8 : vector<128x256xf32>
    %c0_8 = arith.constant 0 : index
    %c0_9 = arith.constant 0 : index
    %10 = vector.load %arg3[%c0_8, %c0_9] : memref<128x128xbf16, #tpu.memory_space<vmem>>, vector<128x128xbf16>
    %11 = arith.truncf %9 : vector<128x256xf32> to vector<128x256xbf16>
    %cst_10 = arith.constant dense<0.000000e+00> : vector<128x256xf32>
    %12 = tpu.matmul %10, %11, %cst_10 {dimension_numbers = #tpu.dot_dimension_numbers<[1], [0], [0], [1], [0, 0, 1, 1], [], []>} : vector<128x128xbf16>, vector<128x256xbf16>, vector<128x256xf32> -> vector<128x256xf32>
    %13 = vector.broadcast %1 : vector<128x1xf32> to vector<128x256xf32>
    %14 = arith.addf %12, %13 : vector<128x256xf32>
    %cst_11 = arith.constant 0.000000e+00 : f32
    %15 = vector.broadcast %cst_11 : f32 to vector<128x256xf32>
    %16 = arith.maximumf %14, %15 : vector<128x256xf32>
    %c0_12 = arith.constant 0 : index
    %c0_13 = arith.constant 0 : index
    %17 = vector.load %arg4[%c0_12, %c0_13] : memref<128x128xbf16, #tpu.memory_space<vmem>>, vector<128x128xbf16>
    %18 = arith.truncf %16 : vector<128x256xf32> to vector<128x256xbf16>
    %cst_14 = arith.constant dense<0.000000e+00> : vector<128x256xf32>
    %19 = tpu.matmul %17, %18, %cst_14 {dimension_numbers = #tpu.dot_dimension_numbers<[1], [0], [0], [1], [0, 0, 1, 1], [], []>} : vector<128x128xbf16>, vector<128x256xbf16>, vector<128x256xf32> -> vector<128x256xf32>
    %20 = vector.broadcast %2 : vector<128x1xf32> to vector<128x256xf32>
    %21 = arith.addf %19, %20 : vector<128x256xf32>
    %cst_15 = arith.constant 0.000000e+00 : f32
    %22 = vector.broadcast %cst_15 : f32 to vector<128x256xf32>
    %23 = arith.maximumf %21, %22 : vector<128x256xf32>
    %c0_16 = arith.constant 0 : index
    %c0_17 = arith.constant 0 : index
    %24 = vector.load %arg6[%c0_16, %c0_17] : memref<1x128xbf16, #tpu.memory_space<vmem>>, vector<1x128xbf16>
    %25 = arith.truncf %23 : vector<128x256xf32> to vector<128x256xbf16>
    %cst_18 = arith.constant dense<0.000000e+00> : vector<1x256xf32>
    %26 = tpu.matmul %24, %25, %cst_18 {dimension_numbers = #tpu.dot_dimension_numbers<[1], [0], [0], [1], [0, 0, 1, 1], [], []>} : vector<1x128xbf16>, vector<128x256xbf16>, vector<1x256xf32> -> vector<1x256xf32>
    %c0_19 = arith.constant 0 : index
    %27 = memref.load %arg7[%c0_19] : memref<1xf32, #tpu.memory_space<smem>>
    %28 = vector.broadcast %27 : f32 to vector<1x256xf32>
    %29 = arith.addf %26, %28 : vector<1x256xf32>
    %30 = math.tanh %29 : vector<1x256xf32>
    %c0_20 = arith.constant 0 : index
    %c0_21 = arith.constant 0 : index
    %31 = vector.load %arg8[%c0_20, %c0_21] : memref<1x256xf32, #tpu.memory_space<vmem>>, vector<1x256xf32>
    tpu.vector_store %arg8[%c0_20, %c0_21], %30 {strides = array<i32>} : memref<1x256xf32, #tpu.memory_space<vmem>>, vector<1x256xf32>,
    return
  }
  func.func @transform_0(%arg0: i32) -> (i32, i32) {
    %c0_i32 = arith.constant 0 : i32
    %c0_i32_0 = arith.constant 0 : i32
    return %c0_i32, %arg0 : i32, i32
  }
  func.func @transform_1(%arg0: i32) -> (i32, i32) {
    %c0_i32 = arith.constant 0 : i32
    %c0_i32_0 = arith.constant 0 : i32
    %c0_i32_1 = arith.constant 0 : i32
    return %c0_i32, %c0_i32_0 : i32, i32
  }
  func.func @transform_2(%arg0: i32) -> (i32, i32) {
    %c0_i32 = arith.constant 0 : i32
    %c0_i32_0 = arith.constant 0 : i32
    %c0_i32_1 = arith.constant 0 : i32
    return %c0_i32, %c0_i32_0 : i32, i32
  }
  func.func @transform_3(%arg0: i32) -> (i32, i32) {
    %c0_i32 = arith.constant 0 : i32
    %c0_i32_0 = arith.constant 0 : i32
    %c0_i32_1 = arith.constant 0 : i32
    return %c0_i32, %c0_i32_0 : i32, i32
  }
  func.func @transform_4(%arg0: i32) -> (i32, i32) {
    %c0_i32 = arith.constant 0 : i32
    %c0_i32_0 = arith.constant 0 : i32
    %c0_i32_1 = arith.constant 0 : i32
    return %c0_i32, %c0_i32_0 : i32, i32
  }
  func.func @transform_5(%arg0: i32) -> (i32, i32) {
    %c0_i32 = arith.constant 0 : i32
    %c0_i32_0 = arith.constant 0 : i32
    %c0_i32_1 = arith.constant 0 : i32
    return %c0_i32, %c0_i32_0 : i32, i32
  }
  func.func @transform_6(%arg0: i32) -> i32 {
    %c0_i32 = arith.constant 0 : i32
    %c0_i32_0 = arith.constant 0 : i32
    return %c0_i32 : i32
  }
  func.func @transform_7(%arg0: i32) -> (i32, i32) {
    %c0_i32 = arith.constant 0 : i32
    %c0_i32_0 = arith.constant 0 : i32
    return %c0_i32, %arg0 : i32, i32
  }
}

</mosaic_0001>

<bundles_post_ra>
// kernel: barrier_forward.1
= control target key start
LH: loop header
LB: loop body
LE: loop exit
PB: predicated region body
PF: predicated region fallthrough
CT: control target
= control target key end

     0   :  { %s2048_s0 = inlined_call_operand.vmem [shape: bf16[32,512], index: 0, kind: input, shape index: {}]   ;;  %s2049_s1 = inlined_call_operand.vmem [shape: bf16[128,32], index: 1, kind: input, shape index: {}]   ;;  %s2050_s2 = inlined_call_operand.vmem [shape: bf16[128,128], index: 2, kind: input, shape index: {}]   ;;  %s2051_s3 = inlined_call_operand.vmem [shape: bf16[128,128], index: 3, kind: input, shape index: {}]   ;;  %s2052_s4 = inlined_call_operand.vmem [shape: f32[128,3], index: 4, kind: input, shape index: {}]   ;;  %s2053_s5 = inlined_call_operand.vmem [shape: bf16[1,128], index: 5, kind: input, shape index: {}]   ;;  %s2054_s6 = inlined_call_operand.<no memory space> [shape: f32[1], index: 6, kind: input, shape index: {}]   ;;  %s2055_s7 = inlined_call_operand.hbm [shape: f32[1,512], index: 7, kind: output, shape index: {}]  }
   0x1   :  { %12 = sst [smem:[#allocation2]] %s2054_s6 }
   0x2   :  { %13 = vsyncpa [#allocation5], 0 }
   0x3   :  { %15 = vsyncpa [#allocation5 + $0x1], 0  ;;  %s1668_s26 = smov 0   ;;  %s1670_s27 = smov 0  }
   0x4   :  { %s1672_s28 = smov 0   ;;  %s1674_s29 = smov 0  }
   0x5 LB: > { %s1416_s6 = sadd.s32 4294967295, %s1618_s29   ;;  %s1417_s30 = sadd.s32 4294967294, %s1618_s29   ;;  %s1618_s29 = sphi %s1674_s29, %s2061_s29   ;;  %s1614_s28 = sphi %s1672_s28, %s2060_s28   ;;  %s1610_s27 = sphi %s1670_s27, %s2059_s27   ;;  %s1606_s26 = sphi %s1668_s26, %s2058_s26  }
   0x6   : > { %s1691_s8 = sadd.s32 1, %s1618_s29   ;;  %s28_s9 = sadd.s32 1, %s1614_s28 }
   0x7   : > { %s25_s10 = ssub.s32 %s1618_s29, %s1691_s8  ;;  %p35_p0 = scmp.ne.s32.totalorder %s1614_s28, %s1610_s27 }
   0x8   : > { %p26_p1 = scmp.eq.s32.totalorder %s25_s10, 0  ;;  %p36_p2 = scmp.eq.s32.totalorder %s1618_s29, 0 }
   0x9   : > { %p191_p3 = scmp.eq.s32.totalorder %s1416_s6, 1  ;;  %p196_p4 = scmp.ne.s32.totalorder %s1610_s27, %s1606_s26 }
   0xa   : > { %s1704_s11 = scalar_select %p26_p1, %s1614_s28, %s28_s9  }
   0xb   : > { %p37_p5 = por %p36_p2, %p35_p0  ;;  %p1706_p6 = por %p191_p3, %p35_p0 }
   0xc   : > { %p197_p7 = scmp.eq.s32.totalorder %s1417_s30, 1  ;;  %p1419_p9 = scmp.ge.s32.totalorder %s1618_s29, 2 }
   0xe   : > { %p1710_p8 = por %p197_p7, %p196_p4  ;;  %231 = sbr.rel (%p1419_p9) target bundleno = 28 (0x1c), region = 40 }
  0x15   : > { %234 = sbr.rel (!%p37_p5) target bundleno = 28 (0x1c), region = 44  ;;  %s236_s14 = sand.u32 (%p37_p5), 1, %s1614_s28  }
  0x16   : > { %s1467_s15 = sshll.u32 (%p37_p5), %s1618_s29, 3  ;;  %s1420_s16 = sshll.u32 (%p37_p5), %s236_s14, 5 }
  0x17   : > { %s241_s19 = scalar_lea.vmem (%p37_p5), %s2048_s0, %s1467_s15  ;;  %s238_s20 = scalar_lea.vmem (%p37_p5), [#allocation3], %s1420_s16 }
  0x18   : > { %v275_v0 = vld [vmem:[%s241_s19] sm:$0xff] (%p37_p5)  ;;  %v277_v1 = vld [vmem:[%s241_s19 + $0x10] sm:$0xff] (%p37_p5) }
  0x19   : > { %v279_v2 = vld [vmem:[%s241_s19 + $0x20] sm:$0xff] (%p37_p5)  ;;  %276 = vst [vmem:[%s238_s20] sm:$0xff] (%p37_p5), %v275_v0  ;;  %278 = vst [vmem:[%s238_s20 + $0x8] sm:$0xff] (%p37_p5), %v277_v1  ;;  %v281_v3 = vld [vmem:[%s241_s19 + $0x30] sm:$0xff] (%p37_p5) }
  0x1a   : > { %280 = vst [vmem:[%s238_s20 + $0x10] sm:$0xff] (%p37_p5), %v279_v2  ;;  %282 = vst [vmem:[%s238_s20 + $0x18] sm:$0xff] (%p37_p5), %v281_v3 }
  0x1c PF: > { %p1423_p10 = scmp.ge.s32.totalorder %s1618_s29, 1  ;;  %p287_p11 = scmp.lt.s32.totalorder %s1618_s29, 3 }
  0x1e   : > { %p288_p12 = pnand %p1423_p10, %p287_p11 }
  0x1f   : > { %s1725_s21 = sand.u32 (!%p288_p12), 1, %s1610_s27   ;;  %v1620_v4 = vmov (!%p288_p12), 0   ;;  %v1528_v9 = vld [vmem:[%s2049_s1] sm:$0xff] (!%p288_p12)   ;;  %vm504_vm0 = vcmask (!%p288_p12), 261120   ;;  %v1746_v12 = vld [vmem:[%s2052_s4 + $0x10] sm:$0xff] (!%p288_p12)  ;;  %v1755_v13 = vld [vmem:[%s2052_s4 + $0x8] sm:$0xff] (!%p288_p12) }
  0x20   : > { %291 = sbr.rel (%p288_p12) target bundleno = 1116 (0x45c), region = 82  ;;  %s1424_s22 = sshll.u32 (!%p288_p12), %s1725_s21, 5  ;;  %561 = vmatprep.mubr.bf16.mxu0 (!%p288_p12), %v1620_v4  ;;  %601 = vmatprep.mubr.bf16.mxu1 (!%p288_p12), %v1620_v4  ;;  %v1529_v10 = vld [vmem:[%s2049_s1 + $0x20] sm:$0xff] (!%p288_p12)   ;;  %v1760_v14 = vld [vmem:[%s2052_s4 + $0x18] sm:$0xff] (!%p288_p12)  ;;  %v1530_v15 = vld [vmem:[%s2049_s1 + $0x8] sm:$0xff] (!%p288_p12)   ;;  %v1621_v37 = vmov (!%p288_p12), 1  }
  0x21   : > { %1516 = vset.pattern.permute.xlu0 (!%p288_p12), %v1620_v4  ;;  %1517 = vset.pattern.permute.xlu1 (!%p288_p12), %v1620_v4  ;;  %s296_s23 = scalar_lea.vmem (!%p288_p12), [#allocation3], %s1424_s22  ;;  %v1741_v11 = vld [vmem:[%s2052_s4] sm:$0xff] (!%p288_p12)  ;;  %v1531_v16 = vld [vmem:[%s2049_s1 + $0x28] sm:$0xff] (!%p288_p12)   ;;  %v1785_v19 = vld [vmem:[%s2052_s4 + $0x30] sm:$0xff] (!%p288_p12)  ;;  %s1269_s22 = sld [smem:[#allocation2]] (!%p288_p12) }
  0x22   : > { %v1522_v5 = vld [vmem:[%s296_s23 + $0x4] ss:$8 sps:$4 sm:$0xff] (!%p288_p12)   ;;  %v1524_v6 = vld [vmem:[%s296_s23] ss:$8 sps:$4 sm:$0xff] (!%p288_p12)   ;;  %v1525_v7 = vld [vmem:[%s296_s23 + $0x14] ss:$8 sps:$4 sm:$0xff] (!%p288_p12)   ;;  %366 = vperm.xlu0 (!%p288_p12), %1516, %v1741_v11   ;;  %376 = vperm.xlu1 (!%p288_p12), %1517, %v1746_v12  }
  0x23   : > { %529 = vmatprep.subr.bf16.mxu0 (!%p288_p12), %v1522_v5  ;;  %1469 = vmatprep.subr.bf16.mxu1 (!%p288_p12), %v1522_v5  ;;  %v1527_v8 = vld [vmem:[%s296_s23 + $0x10] ss:$8 sps:$4 sm:$0xff] (!%p288_p12)   ;;  %v1773_v17 = vld [vmem:[%s2052_s4 + $0x20] sm:$0xff] (!%p288_p12)  ;;  %v1780_v18 = vld [vmem:[%s2052_s4 + $0x28] sm:$0xff] (!%p288_p12)  ;;  %s1425_s23 = sshll.u32 (!%p288_p12), %s1725_s21, 1  ;;  %s1468_s24 = sshll.u32 (!%p288_p12), %s1416_s6, 5 }
  0x24   : > { %530 = vmatpush1.bf16.msra.mxu0 (!%p288_p12), %v1524_v6  ;;  %1471 = vmatpush1.bf16.msra.mxu1 (!%p288_p12), %v1524_v6  ;;  %v1790_v20 = vld [vmem:[%s2052_s4 + $0x38] sm:$0xff] (!%p288_p12)  ;;  %v1532_v21 = vld [vmem:[%s2049_s1 + $0x10] sm:$0xff] (!%p288_p12)   ;;  %v1807_v23 = vld [vmem:[%s2052_s4 + $0x40] sm:$0xff] (!%p288_p12)  ;;  %s324_s25 = scalar_lea.vmem (!%p288_p12), [#allocation4], %s1425_s23  ;;  %s2004_s14 = scalar_lea.hbm (!%p288_p12), %s2055_s7, %s1468_s24 }
  0x25   : > { %531 = vmatprep.subr.bf16.mxu0 (!%p288_p12), %v1525_v7  ;;  %1470 = vmatprep.subr.bf16.mxu1 (!%p288_p12), %v1525_v7  ;;  %v1533_v22 = vld [vmem:[%s2049_s1 + $0x30] sm:$0xff] (!%p288_p12)   ;;  %v1812_v24 = vld [vmem:[%s2052_s4 + $0x48] sm:$0xff] (!%p288_p12)  ;;  %v1828_v26 = vld [vmem:[%s2052_s4 + $0x58] sm:$0xff] (!%p288_p12)  ;;  %s1352_s30 = sshll.u32 (!%p288_p12), %s324_s25, 4  ;;  %s1338_s15 = scalar_lea.sflag (!%p288_p12), [#allocation5], %s1725_s21  ;;  %s2006_s30 = int_to_ptr.vmem [resolvable:$true] %s1352_s30 }
  0x26   : > { %371 = vperm.xlu0 (!%p288_p12), %1516, %v1755_v13   ;;  %381 = vperm.xlu1 (!%p288_p12), %1517, %v1760_v14   ;;  %v1823_v25 = vld [vmem:[%s2052_s4 + $0x50] sm:$0xff] (!%p288_p12)  ;;  %v1534_v27 = vld [vmem:[%s2049_s1 + $0x18] sm:$0xff] (!%p288_p12)   ;;  %v1843_v29 = vld [vmem:[%s2052_s4 + $0x60] sm:$0xff] (!%p288_p12)  ;;  %s1556_s16 = scalar_lea.vmem (!%p288_p12), %s2006_s30, 32  ;;  %s1624_s6 = smov (!%p288_p12), [#allocation4]  }
  0x27   : > { %v1535_v28 = vld [vmem:[%s2049_s1 + $0x38] sm:$0xff]   ;;  %v1848_v30 = vld [vmem:[%s2052_s4 + $0x68] sm:$0xff]  ;;  %v1857_v31 = vld [vmem:[%s2052_s4 + $0x70] sm:$0xff]  ;;  %p1557_p13 = scmp.ne.s32.totalorder %s2006_s30, %s1556_s16  ;;  %s1560_s17 = sshll.u32 %s1624_s6, 4  ;;  %s1561_s17 = int_to_ptr.vmem [resolvable:$false] %s1560_s17 }
  0x28   : > { %532 = vmatpush1.bf16.msra.mxu0 %v1527_v8  ;;  %1472 = vmatpush1.bf16.msra.mxu1 %v1527_v8  ;;  %v1862_v32 = vld [vmem:[%s2052_s4 + $0x78] sm:$0xff]  ;;  %s1562_s18 = scalar_lea.vmem %s1561_s17, 64  ;;  %p1563_p2 = scmp.lt.s32.totalorder %s2006_s30, %s1561_s17 }
  0x29   : > { %p1558_p0 = pnand %p1557_p13, %p1706_p6  ;;  %p1564_p3 = scmp.lt.s32.totalorder %s1562_s18, %s1556_s16 }
  0x2a   : > { %386 = vperm.xlu0 %1516, %v1773_v17   ;;  %391 = vperm.xlu1 %1517, %v1780_v18  }
  0x2b   : > { %1438 = vmatmul.mubr.msk.bf16.vlgmr.msra.gmra.mrb[0].mxu0 %vm504_vm0, %v1528_v9  ;;  %1442 = vmatmul.mubr.msk.bf16.vlgmr.msra.gmra.mrb[0].mxu1 %vm504_vm0, %v1529_v10  ;;  %p1559_p1 = pneg %p1558_p0  ;;  %p1565_p4 = por %p1564_p3, %p1563_p2 }
  0x2c   : > { %571 = vmatprep.mubr.bf16.mxu0 %v1620_v4  ;;  %611 = vmatprep.mubr.bf16.mxu1 %v1620_v4 }
  0x2d   : > { %p1566_p5 = pnand %p1565_p4, %p1559_p1 }
  0x2e   : > { %396 = vperm.xlu0 %1516, %v1785_v19   ;;  %401 = vperm.xlu1 %1517, %v1790_v20  }
  0x32   : > { %406 = vperm.xlu0 %1516, %v1807_v23   ;;  %411 = vperm.xlu1 %1517, %v1812_v24  }
  0x33   : > { %1439 = vmatmul.mubr.msk.bf16.gmra.mrb[4].mxu0 %vm504_vm0, %v1530_v15  ;;  %1443 = vmatmul.mubr.msk.bf16.gmra.mrb[4].mxu1 %vm504_vm0, %v1531_v16 }
  0x34   : > { %581 = vmatprep.mubr.bf16.mxu0 %v1620_v4  ;;  %621 = vmatprep.mubr.bf16.mxu1 %v1620_v4 }
  0x36   : > { %416 = vperm.xlu0 %1516, %v1823_v25   ;;  %421 = vperm.xlu1 %1517, %v1828_v26  }
  0x3a   : > { %426 = vperm.xlu0 %1516, %v1843_v29   ;;  %431 = vperm.xlu1 %1517, %v1848_v30  }
  0x3b   : > { %1440 = vmatmul.mubr.msk.bf16.gmra.mrb[8].mxu0 %vm504_vm0, %v1532_v21  ;;  %1444 = vmatmul.mubr.msk.bf16.gmra.mrb[8].mxu1 %vm504_vm0, %v1533_v22 }
  0x3c   : > { %591 = vmatprep.mubr.bf16.mxu0 %v1620_v4  ;;  %631 = vmatprep.mubr.bf16.mxu1 %v1620_v4 }
  0x3e   : > { %436 = vperm.xlu0 %1516, %v1857_v31   ;;  %441 = vperm.xlu1 %1517, %v1862_v32  }
  0x42   : > { %1518 = vset.pattern.permute.xlu0 %v1621_v37  ;;  %1519 = vset.pattern.permute.xlu1 %v1621_v37 }
  0x43   : > { %1441 = vmatmul.mubr.msk.bf16.gmra.mrb[12].mxu0 %vm504_vm0, %v1534_v27  ;;  %1445 = vmatmul.mubr.msk.bf16.gmra.mrb[12].mxu1 %vm504_vm0, %v1535_v28 }
  0x44   : > { %850 = vmatprep.mubr.bf16.mxu1 %v1620_v4  ;;  %1139 = vmatprep.mubr.bf16.mxu0 %v1620_v4 }
  0x45   : > { %707 = vperm.xlu0 %1518, %v1741_v11   ;;  %711 = vperm.xlu1 %1519, %v1755_v13  }
  0x49   : > { %715 = vperm.xlu1 %1519, %v1746_v12   ;;  %719 = vperm.xlu0 %1518, %v1760_v14  }
  0x4d   : > { %723 = vperm.xlu1 %1519, %v1773_v17   ;;  %727 = vperm.xlu0 %1518, %v1780_v18  }
  0x51   : > { %731 = vperm.xlu1 %1519, %v1785_v19   ;;  %735 = vperm.xlu0 %1518, %v1790_v20  }
  0x55   : > { %739 = vperm.xlu1 %1519, %v1807_v23   ;;  %743 = vperm.xlu0 %1518, %v1812_v24  }
  0x59   : > { %747 = vperm.xlu1 %1519, %v1823_v25   ;;  %751 = vperm.xlu0 %1518, %v1828_v26  }
  0x5d   : > { %755 = vperm.xlu1 %1519, %v1843_v29   ;;  %759 = vperm.xlu0 %1518, %v1848_v30  }
  0x61   : > { %763 = vperm.xlu1 %1519, %v1857_v31   ;;  %767 = vperm.xlu0 %1518, %v1862_v32  }
  0xa1   : > { %v367_v33 = vpop.permute.xlu0 %366  ;;  %v377_v34 = vpop.permute.xlu1 %376 }
  0xa5   : > { %v372_v35 = vpop.permute.xlu0 %371  ;;  %v1868_v36 = vpop.permute.xlu1 %381 }
  0xa9   : > { %v1872_v38 = vpop.permute.xlu0 %386  ;;  %v1874_v39 = vpop.permute.xlu1 %391 }
  0xad   : > { %v1880_v40 = vpop.permute.xlu0 %396  ;;  %v1882_v41 = vpop.permute.xlu1 %401 }
  0xb1   : > { %v407_v42 = vpop.permute.xlu0 %406  ;;  %v412_v43 = vpop.permute.xlu1 %411 }
  0xb5   : > { %v417_v6 = vpop.permute.xlu0 %416  ;;  %v422_v8 = vpop.permute.xlu1 %421 }
  0xfe   : > { %v563_v44 = vpop.f32.mrb[0].mxu0  ;;  %v603_v45 = vpop.f32.mrb[0].mxu1 }
  0xff   : > { %v564_v46 = vadd.f32 %v563_v44, %v367_v33  ;;  %v565_v47 = vpop.f32.mrb[1].mxu0  ;;  %v604_v48 = vadd.f32 %v603_v45, %v407_v42  ;;  %v605_v49 = vpop.f32.mrb[1].mxu1 }
 0x100   : > { %v566_v50 = vadd.f32 %v565_v47, %v367_v33  ;;  %v567_v51 = vpop.f32.mrb[2].mxu0  ;;  %v606_v52 = vadd.f32 %v605_v49, %v407_v42  ;;  %v607_v53 = vpop.f32.mrb[2].mxu1 }
 0x101   : > { %v568_v54 = vadd.f32 %v567_v51, %v372_v35  ;;  %v569_v55 = vpop.f32.mrb[3].mxu0  ;;  %v658_v56 = vmax.f32 %v604_v48, 0.0  ;;  %v608_v57 = vadd.f32 %v607_v53, %v412_v43  ;;  %v609_v58 = vpop.f32.mrb[3].mxu1  ;;  %v642_v62 = vmax.f32 %v564_v46, 0.0 }
 0x102   : > { %v570_v59 = vadd.f32 %v569_v55, %v372_v35  ;;  %v659_v60 = vmax.f32 %v606_v52, 0.0  ;;  %v610_v61 = vadd.f32 %v609_v58, %v412_v43  ;;  %v643_v1 = vmax.f32 %v566_v50, 0.0 }
 0x103   : > { %v644_v63 = vmax.f32 %v568_v54, 0.0  ;;  %v660_v0 = vmax.f32 %v608_v57, 0.0 }
 0x104   : > { %v645_v2 = vmax.f32 %v570_v59, 0.0  ;;  %v661_v3 = vmax.f32 %v610_v61, 0.0  ;;  %v432_v59 = vpop.permute.xlu1 %431 }
 0x105   : > { %v690_v5 = vpack.c.bf16 %v644_v63, %v642_v62  ;;  %v1890_v7 = vpack.c.bf16 %v660_v0, %v658_v56  ;;  %v427_v56 = vpop.permute.xlu0 %426 }
 0x106   : > { %v691_v9 = vpack.c.bf16 %v645_v2, %v643_v1  ;;  %v1892_v10 = vpack.c.bf16 %v661_v3, %v659_v60  ;;  %v573_v15 = vpop.f32.mrb[4].mxu0  ;;  %v613_v16 = vpop.f32.mrb[4].mxu1 }
 0x107   : > { %v574_v21 = vadd.f32 %v573_v15, %v377_v34  ;;  %v614_v22 = vadd.f32 %v613_v16, %v417_v6  ;;  %v575_v27 = vpop.f32.mrb[5].mxu0  ;;  %v615_v28 = vpop.f32.mrb[5].mxu1 }
 0x108   : > { %v576_v33 = vadd.f32 %v575_v27, %v377_v34  ;;  %v616_v35 = vadd.f32 %v615_v28, %v417_v6  ;;  %v577_v37 = vpop.f32.mrb[6].mxu0  ;;  %v617_v42 = vpop.f32.mrb[6].mxu1  ;;  %818 = vmatprep.subr.bf16.mxu1 %v691_v9 }
 0x109   : > { %v662_v43 = vmax.f32 %v614_v22, 0.0  ;;  %v578_v44 = vadd.f32 %v577_v37, %v1868_v36  ;;  %v618_v45 = vadd.f32 %v617_v42, %v422_v8  ;;  %v579_v46 = vpop.f32.mrb[7].mxu0  ;;  %v619_v47 = vpop.f32.mrb[7].mxu1  ;;  %819 = vmatpush1.bf16.msra.mxu1 %v690_v5  ;;  %v646_v34 = vmax.f32 %v574_v21, 0.0 }
 0x10a   : > { %v663_v48 = vmax.f32 %v616_v35, 0.0  ;;  %v580_v49 = vadd.f32 %v579_v46, %v1868_v36  ;;  %v620_v50 = vadd.f32 %v619_v47, %v422_v8  ;;  %v647_v53 = vmax.f32 %v576_v33, 0.0  ;;  %v442_v46 = vpop.permute.xlu1 %441 }
 0x10b   : > { %v648_v51 = vmax.f32 %v578_v44, 0.0  ;;  %v664_v52 = vmax.f32 %v618_v45, 0.0  ;;  %v437_v45 = vpop.permute.xlu0 %436 }
 0x10c   : > { %v649_v54 = vmax.f32 %v580_v49, 0.0  ;;  %v665_v55 = vmax.f32 %v620_v50, 0.0 }
 0x10d   : > { %v692_v57 = vpack.c.bf16 %v648_v51, %v646_v34  ;;  %v1900_v58 = vpack.c.bf16 %v664_v52, %v662_v43 }
 0x10e   : > { %v693_v60 = vpack.c.bf16 %v649_v54, %v647_v53  ;;  %v1902_v61 = vpack.c.bf16 %v665_v55, %v663_v48  ;;  %v583_v36 = vpop.f32.mrb[8].mxu0  ;;  %v623_v62 = vpop.f32.mrb[8].mxu1 }
 0x10f   : > { %v584_v63 = vadd.f32 %v583_v36, %v1872_v38  ;;  %v624_v0 = vadd.f32 %v623_v62, %v427_v56  ;;  %v585_v1 = vpop.f32.mrb[9].mxu0  ;;  %v625_v2 = vpop.f32.mrb[9].mxu1 }
 0x110   : > { %v586_v3 = vadd.f32 %v585_v1, %v1872_v38  ;;  %v626_v5 = vadd.f32 %v625_v2, %v427_v56  ;;  %v587_v6 = vpop.f32.mrb[10].mxu0  ;;  %v627_v8 = vpop.f32.mrb[10].mxu1  ;;  %820 = vmatprep.subr.bf16.mxu1 %v693_v60 }
 0x111   : > { %v588_v9 = vadd.f32 %v587_v6, %v1874_v39  ;;  %v628_v15 = vadd.f32 %v627_v8, %v432_v59  ;;  %v589_v16 = vpop.f32.mrb[11].mxu0  ;;  %v629_v21 = vpop.f32.mrb[11].mxu1  ;;  %821 = vmatpush1.bf16.msra.mxu1 %v692_v57  ;;  %v650_v28 = vmax.f32 %v584_v63, 0.0  ;;  %v666_v33 = vmax.f32 %v624_v0, 0.0 }
 0x112   : > { %v590_v22 = vadd.f32 %v589_v16, %v1874_v39  ;;  %v630_v27 = vadd.f32 %v629_v21, %v432_v59  ;;  %v651_v42 = vmax.f32 %v586_v3, 0.0  ;;  %v667_v43 = vmax.f32 %v626_v5, 0.0 }
 0x113   : > { %v652_v35 = vmax.f32 %v588_v9, 0.0  ;;  %v668_v37 = vmax.f32 %v628_v15, 0.0 }
 0x114   : > { %v653_v38 = vmax.f32 %v590_v22, 0.0  ;;  %v669_v44 = vmax.f32 %v630_v27, 0.0 }
 0x115   : > { %v694_v47 = vpack.c.bf16 %v652_v35, %v650_v28  ;;  %v702_v48 = vpack.c.bf16 %v668_v37, %v666_v33  ;;  %v1541_v28 = vld [vmem:[%s2050_s2 + $0x28] sm:$0xff]   ;;  %v1542_v33 = vld [vmem:[%s2050_s2 + $0x30] sm:$0xff]   ;;  %v1543_v35 = vld [vmem:[%s2050_s2 + $0x38] sm:$0xff]   ;;  %v1622_v37 = vmov 2  }
 0x116   : > { %v695_v49 = vpack.c.bf16 %v653_v38, %v651_v42  ;;  %v703_v50 = vpack.c.bf16 %v669_v44, %v667_v43  ;;  %v593_v34 = vpop.f32.mrb[12].mxu0  ;;  %v633_v51 = vpop.f32.mrb[12].mxu1  ;;  %1520 = vset.pattern.permute.xlu1 %v1622_v37  ;;  %1521 = vset.pattern.permute.xlu0 %v1622_v37 }
 0x117   : > { %v594_v52 = vadd.f32 %v593_v34, %v1880_v40  ;;  %v634_v39 = vadd.f32 %v633_v51, %v437_v45  ;;  %v595_v53 = vpop.f32.mrb[13].mxu0  ;;  %v635_v54 = vpop.f32.mrb[13].mxu1  ;;  %996 = vperm.xlu1 %1520, %v1741_v11   ;;  %1000 = vperm.xlu0 %1521, %v1755_v13  }
 0x118   : > { %v596_v55 = vadd.f32 %v595_v53, %v1880_v40  ;;  %v636_v56 = vadd.f32 %v635_v54, %v437_v45  ;;  %v597_v57 = vpop.f32.mrb[14].mxu0  ;;  %v637_v59 = vpop.f32.mrb[14].mxu1  ;;  %822 = vmatprep.subr.bf16.mxu1 %v695_v49 }
 0x119   : > { %v598_v60 = vadd.f32 %v597_v57, %v1882_v41  ;;  %v638_v36 = vadd.f32 %v637_v59, %v442_v46  ;;  %v599_v62 = vpop.f32.mrb[15].mxu0  ;;  %v639_v63 = vpop.f32.mrb[15].mxu1  ;;  %823 = vmatpush1.bf16.msra.mxu1 %v694_v47  ;;  %v654_v2 = vmax.f32 %v594_v52, 0.0  ;;  %v670_v3 = vmax.f32 %v634_v39, 0.0 }
 0x11a   : > { %v600_v0 = vadd.f32 %v599_v62, %v1882_v41  ;;  %v640_v1 = vadd.f32 %v639_v63, %v442_v46  ;;  %v655_v8 = vmax.f32 %v596_v55, 0.0  ;;  %v671_v9 = vmax.f32 %v636_v56, 0.0  ;;  %v1536_v41 = vld [vmem:[%s2050_s2] sm:$0xff]   ;;  %v708_v42 = vpop.permute.xlu0 %707  ;;  %v712_v38 = vpop.permute.xlu1 %711 }
 0x11b   : > { %v656_v5 = vmax.f32 %v598_v60, 0.0  ;;  %v672_v6 = vmax.f32 %v638_v36, 0.0  ;;  %1004 = vperm.xlu1 %1520, %v1746_v12   ;;  %1012 = vperm.xlu0 %1521, %v1773_v17  }
 0x11c   : > { %v657_v40 = vmax.f32 %v600_v0, 0.0  ;;  %v673_v15 = vmax.f32 %v640_v1, 0.0 }
 0x11d   : > { %v696_v16 = vpack.c.bf16 %v656_v5, %v654_v2  ;;  %v704_v21 = vpack.c.bf16 %v672_v6, %v670_v3 }
 0x11e   : > { %v697_v22 = vpack.c.bf16 %v657_v40, %v655_v8  ;;  %v705_v27 = vpack.c.bf16 %v673_v15, %v671_v9  ;;  %v716_v34 = vpop.permute.xlu1 %715  ;;  %v720_v53 = vpop.permute.xlu0 %719 }
 0x11f   : > { %1008 = vperm.xlu1 %1520, %v1760_v14   ;;  %1020 = vperm.xlu0 %1521, %v1785_v19  }
 0x120   : > { %824 = vmatprep.subr.bf16.mxu1 %v697_v22 }
 0x121   : > { %825 = vmatpush1.bf16.msra.mxu1 %v696_v16 }
 0x122   : > { %826 = vmatprep.subr.bf16.mxu1 %v1892_v10  ;;  %v1537_v10 = vld [vmem:[%s2050_s2 + $0x8] sm:$0xff]   ;;  %v728_v2 = vpop.permute.xlu0 %727 }
 0x123   : > { %1016 = vperm.xlu1 %1520, %v1780_v18   ;;  %1028 = vperm.xlu0 %1521, %v1807_v23  }
 0x125   : > { %827 = vmatpush1.bf16.msra.mxu1 %v1890_v7  ;;  %v1538_v7 = vld [vmem:[%s2050_s2 + $0x10] sm:$0xff]  }
 0x126   : > { %828 = vmatprep.subr.bf16.mxu1 %v1902_v61  ;;  %v1540_v61 = vld [vmem:[%s2050_s2 + $0x20] sm:$0xff]  }
 0x127   : > { %1024 = vperm.xlu1 %1520, %v1790_v20   ;;  %1036 = vperm.xlu0 %1521, %v1823_v25   ;;  %v724_v25 = vpop.permute.xlu1 %723 }
 0x129   : > { %829 = vmatpush1.bf16.msra.mxu1 %v1900_v58  ;;  %v1539_v58 = vld [vmem:[%s2050_s2 + $0x18] sm:$0xff]  }
 0x12a   : > { %830 = vmatprep.subr.bf16.mxu1 %v703_v50 }
 0x12b   : > { %1032 = vperm.xlu1 %1520, %v1812_v24   ;;  %1044 = vperm.xlu0 %1521, %v1843_v29  }
 0x12d   : > { %831 = vmatpush1.bf16.msra.mxu1 %v702_v48 }
 0x12e   : > { %832 = vmatprep.subr.bf16.mxu1 %v705_v27 }
 0x12f   : > { %1040 = vperm.xlu1 %1520, %v1828_v26   ;;  %1052 = vperm.xlu0 %1521, %v1857_v31   ;;  %v732_v26 = vpop.permute.xlu1 %731 }
 0x131   : > { %833 = vmatpush1.bf16.msra.mxu1 %v704_v21 }
 0x133   : > { %1048 = vperm.xlu1 %1520, %v1848_v30  }
 0x134   : > { %851 = vmatmul.mubr.bf16.vlgmr.msra.gmra.mrb[16].mxu1 %v1536_v41  ;;  %v736_v41 = vpop.permute.xlu0 %735 }
 0x135   : > { %860 = vmatprep.mubr.bf16.mxu1 %v1620_v4 }
 0x137   : > { %1056 = vperm.xlu1 %1520, %v1862_v32  }
 0x13c   : > { %861 = vmatmul.mubr.bf16.gmra.mrb[20].mxu1 %v1537_v10 }
 0x13d   : > { %870 = vmatprep.mubr.bf16.mxu1 %v1620_v4 }
 0x144   : > { %871 = vmatmul.mubr.bf16.gmra.mrb[24].mxu1 %v1538_v7 }
 0x145   : > { %880 = vmatprep.mubr.bf16.mxu1 %v1620_v4 }
 0x14c   : > { %881 = vmatmul.mubr.bf16.gmra.mrb[28].mxu1 %v1539_v58 }
 0x14d   : > { %890 = vmatprep.mubr.bf16.mxu1 %v1620_v4 }
 0x154   : > { %891 = vmatmul.mubr.bf16.gmra.mrb[32].mxu1 %v1540_v61 }
 0x155   : > { %900 = vmatprep.mubr.bf16.mxu1 %v1620_v4 }
 0x15c   : > { %901 = vmatmul.mubr.bf16.gmra.mrb[36].mxu1 %v1541_v28 }
 0x15d   : > { %910 = vmatprep.mubr.bf16.mxu1 %v1620_v4 }
 0x164   : > { %911 = vmatmul.mubr.bf16.gmra.mrb[40].mxu1 %v1542_v33 }
 0x165   : > { %920 = vmatprep.mubr.bf16.mxu1 %v1620_v4 }
 0x16c   : > { %921 = vmatmul.mubr.bf16.gmra.mrb[44].mxu1 %v1543_v35 }
 0x16d   : > { %1303 = vmatprep.mubr.bf16.mxu1 %v1620_v4 }
 0x207   : > { %v852_v43 = vpop.f32.mrb[16].mxu1 }
 0x208   : > { %v853_v44 = vadd.f32 %v852_v43, %v708_v42  ;;  %v854_v45 = vpop.f32.mrb[17].mxu1  ;;  %v740_v43 = vpop.permute.xlu1 %739 }
 0x209   : > { %v855_v46 = vadd.f32 %v854_v45, %v708_v42  ;;  %v856_v47 = vpop.f32.mrb[18].mxu1 }
 0x20a   : > { %v857_v48 = vadd.f32 %v856_v47, %v712_v38  ;;  %v858_v49 = vpop.f32.mrb[19].mxu1  ;;  %v931_v12 = vmax.f32 %v853_v44, 0.0 }
 0x20b   : > { %v859_v11 = vadd.f32 %v858_v49, %v712_v38  ;;  %v932_v17 = vmax.f32 %v855_v46, 0.0  ;;  %v744_v46 = vpop.permute.xlu0 %743 }
 0x20c   : > { %v933_v13 = vmax.f32 %v857_v48, 0.0 }
 0x20d   : > { %v934_v50 = vmax.f32 %v859_v11, 0.0 }
 0x20e   : > { %v979_v51 = vpack.c.bf16 %v933_v13, %v931_v12 }
 0x20f   : > { %v980_v14 = vpack.c.bf16 %v934_v50, %v932_v17  ;;  %v862_v52 = vpop.f32.mrb[20].mxu1 }
 0x210   : > { %v863_v19 = vadd.f32 %v862_v52, %v716_v34  ;;  %v864_v39 = vpop.f32.mrb[21].mxu1 }
 0x211   : > { %v865_v54 = vadd.f32 %v864_v39, %v716_v34  ;;  %v866_v55 = vpop.f32.mrb[22].mxu1  ;;  %1107 = vmatprep.subr.bf16.mxu0 %v980_v14  ;;  %v748_v14 = vpop.permute.xlu1 %747 }
 0x212   : > { %v867_v18 = vadd.f32 %v866_v55, %v720_v53  ;;  %v868_v23 = vpop.f32.mrb[23].mxu1  ;;  %1108 = vmatpush1.bf16.msra.mxu0 %v979_v51  ;;  %v935_v57 = vmax.f32 %v863_v19, 0.0 }
 0x213   : > { %v869_v56 = vadd.f32 %v868_v23, %v720_v53  ;;  %v936_v60 = vmax.f32 %v865_v54, 0.0  ;;  %v752_v54 = vpop.permute.xlu0 %751 }
 0x214   : > { %v937_v59 = vmax.f32 %v867_v18, 0.0 }
 0x215   : > { %v938_v20 = vmax.f32 %v869_v56, 0.0 }
 0x216   : > { %v981_v36 = vpack.c.bf16 %v937_v59, %v935_v57 }
 0x217   : > { %v982_v62 = vpack.c.bf16 %v938_v20, %v936_v60  ;;  %v872_v63 = vpop.f32.mrb[24].mxu1 }
 0x218   : > { %v873_v0 = vadd.f32 %v872_v63, %v724_v25  ;;  %v874_v1 = vpop.f32.mrb[25].mxu1 }
 0x219   : > { %v875_v3 = vadd.f32 %v874_v1, %v724_v25  ;;  %v876_v5 = vpop.f32.mrb[26].mxu1  ;;  %1109 = vmatprep.subr.bf16.mxu0 %v982_v62  ;;  %v756_v62 = vpop.permute.xlu1 %755 }
 0x21a   : > { %v877_v24 = vadd.f32 %v876_v5, %v728_v2  ;;  %v878_v29 = vpop.f32.mrb[27].mxu1  ;;  %1110 = vmatpush1.bf16.msra.mxu0 %v981_v36  ;;  %v939_v8 = vmax.f32 %v873_v0, 0.0 }
 0x21b   : > { %v879_v6 = vadd.f32 %v878_v29, %v728_v2  ;;  %v940_v40 = vmax.f32 %v875_v3, 0.0  ;;  %v760_v3 = vpop.permute.xlu0 %759 }
 0x21c   : > { %v941_v9 = vmax.f32 %v877_v24, 0.0 }
 0x21d   : > { %v942_v15 = vmax.f32 %v879_v6, 0.0 }
 0x21e   : > { %v983_v16 = vpack.c.bf16 %v941_v9, %v939_v8 }
 0x21f   : > { %v984_v21 = vpack.c.bf16 %v942_v15, %v940_v40  ;;  %v882_v31 = vpop.f32.mrb[28].mxu1 }
 0x220   : > { %v883_v22 = vadd.f32 %v882_v31, %v732_v26  ;;  %v884_v27 = vpop.f32.mrb[29].mxu1 }
 0x221   : > { %v885_v10 = vadd.f32 %v884_v27, %v732_v26  ;;  %v886_v7 = vpop.f32.mrb[30].mxu1  ;;  %1111 = vmatprep.subr.bf16.mxu0 %v984_v21  ;;  %v764_v21 = vpop.permute.xlu1 %763 }
 0x222   : > { %v887_v58 = vadd.f32 %v886_v7, %v736_v41  ;;  %v888_v61 = vpop.f32.mrb[31].mxu1  ;;  %1112 = vmatpush1.bf16.msra.mxu0 %v983_v16  ;;  %v943_v28 = vmax.f32 %v883_v22, 0.0 }
 0x223   : > { %v889_v30 = vadd.f32 %v888_v61, %v736_v41  ;;  %v944_v35 = vmax.f32 %v885_v10, 0.0  ;;  %v768_v10 = vpop.permute.xlu0 %767 }
 0x224   : > { %v945_v33 = vmax.f32 %v887_v58, 0.0 }
 0x225   : > { %v946_v37 = vmax.f32 %v889_v30, 0.0 }
 0x226   : > { %v985_v42 = vpack.c.bf16 %v945_v33, %v943_v28 }
 0x227   : > { %v986_v38 = vpack.c.bf16 %v946_v37, %v944_v35  ;;  %v892_v44 = vpop.f32.mrb[32].mxu1 }
 0x228   : > { %v893_v45 = vadd.f32 %v892_v44, %v740_v43  ;;  %v894_v32 = vpop.f32.mrb[33].mxu1  ;;  %v1544_v44 = vld [vmem:[%s2051_s3] sm:$0xff]  }
 0x229   : > { %v895_v47 = vadd.f32 %v894_v32, %v740_v43  ;;  %v896_v48 = vpop.f32.mrb[34].mxu1  ;;  %1113 = vmatprep.subr.bf16.mxu0 %v986_v38  ;;  %v1546_v32 = vld [vmem:[%s2051_s3 + $0x10] sm:$0xff]  }
 0x22a   : > { %v897_v49 = vadd.f32 %v896_v48, %v744_v46  ;;  %v898_v11 = vpop.f32.mrb[35].mxu1  ;;  %1114 = vmatpush1.bf16.msra.mxu0 %v985_v42  ;;  %v947_v13 = vmax.f32 %v893_v45, 0.0  ;;  %v1545_v45 = vld [vmem:[%s2051_s3 + $0x8] sm:$0xff]  }
 0x22b   : > { %v899_v12 = vadd.f32 %v898_v11, %v744_v46  ;;  %v948_v50 = vmax.f32 %v895_v47, 0.0  ;;  %v1547_v46 = vld [vmem:[%s2051_s3 + $0x18] sm:$0xff]   ;;  %v1548_v47 = vld [vmem:[%s2051_s3 + $0x20] sm:$0xff]   ;;  %v1549_v48 = vld [vmem:[%s2051_s3 + $0x28] sm:$0xff]  }
 0x22c   : > { %v949_v17 = vmax.f32 %v897_v49, 0.0  ;;  %v1550_v49 = vld [vmem:[%s2051_s3 + $0x30] sm:$0xff]   ;;  %v1551_v11 = vld [vmem:[%s2051_s3 + $0x38] sm:$0xff]  }
 0x22d   : > { %v950_v34 = vmax.f32 %v899_v12, 0.0  ;;  %v997_v12 = vpop.permute.xlu1 %996 }
 0x22e   : > { %v987_v51 = vpack.c.bf16 %v949_v17, %v947_v13  ;;  %v1001_v13 = vpop.permute.xlu0 %1000 }
 0x22f   : > { %v988_v52 = vpack.c.bf16 %v950_v34, %v948_v50  ;;  %v902_v19 = vpop.f32.mrb[36].mxu1 }
 0x230   : > { %v903_v39 = vadd.f32 %v902_v19, %v748_v14  ;;  %v904_v53 = vpop.f32.mrb[37].mxu1 }
 0x231   : > { %v905_v55 = vadd.f32 %v904_v53, %v748_v14  ;;  %v906_v18 = vpop.f32.mrb[38].mxu1  ;;  %1115 = vmatprep.subr.bf16.mxu0 %v988_v52 }
 0x232   : > { %v907_v23 = vadd.f32 %v906_v18, %v752_v54  ;;  %v908_v56 = vpop.f32.mrb[39].mxu1  ;;  %1116 = vmatpush1.bf16.msra.mxu0 %v987_v51  ;;  %v951_v59 = vmax.f32 %v903_v39, 0.0  ;;  %v1005_v39 = vpop.permute.xlu1 %1004 }
 0x233   : > { %v909_v57 = vadd.f32 %v908_v56, %v752_v54  ;;  %v952_v20 = vmax.f32 %v905_v55, 0.0 }
 0x234   : > { %v953_v60 = vmax.f32 %v907_v23, 0.0 }
 0x235   : > { %v954_v36 = vmax.f32 %v909_v57, 0.0 }
 0x236   : > { %v989_v25 = vpack.c.bf16 %v953_v60, %v951_v59 }
 0x237   : > { %v990_v63 = vpack.c.bf16 %v954_v36, %v952_v20  ;;  %v912_v0 = vpop.f32.mrb[40].mxu1  ;;  %v1009_v20 = vpop.permute.xlu1 %1008 }
 0x238   : > { %v913_v1 = vadd.f32 %v912_v0, %v756_v62  ;;  %v914_v2 = vpop.f32.mrb[41].mxu1 }
 0x239   : > { %v915_v5 = vadd.f32 %v914_v2, %v756_v62  ;;  %v916_v24 = vpop.f32.mrb[42].mxu1  ;;  %1117 = vmatprep.subr.bf16.mxu0 %v990_v63 }
 0x23a   : > { %v917_v29 = vadd.f32 %v916_v24, %v760_v3  ;;  %v918_v6 = vpop.f32.mrb[43].mxu1  ;;  %1118 = vmatpush1.bf16.msra.mxu0 %v989_v25  ;;  %v955_v9 = vmax.f32 %v913_v1, 0.0 }
 0x23b   : > { %v919_v8 = vadd.f32 %v918_v6, %v760_v3  ;;  %v956_v15 = vmax.f32 %v915_v5, 0.0 }
 0x23c   : > { %v957_v40 = vmax.f32 %v917_v29, 0.0  ;;  %v1013_v29 = vpop.permute.xlu0 %1012 }
 0x23d   : > { %v958_v16 = vmax.f32 %v919_v8, 0.0 }
 0x23e   : > { %v991_v26 = vpack.c.bf16 %v957_v40, %v955_v9 }
 0x23f   : > { %v992_v31 = vpack.c.bf16 %v958_v16, %v956_v15  ;;  %v922_v22 = vpop.f32.mrb[44].mxu1  ;;  %v1017_v15 = vpop.permute.xlu1 %1016 }
 0x240   : > { %v923_v27 = vadd.f32 %v922_v22, %v764_v21  ;;  %v924_v41 = vpop.f32.mrb[45].mxu1 }
 0x241   : > { %v925_v7 = vadd.f32 %v924_v41, %v764_v21  ;;  %v926_v58 = vpop.f32.mrb[46].mxu1  ;;  %1119 = vmatprep.subr.bf16.mxu0 %v992_v31 }
 0x242   : > { %v927_v61 = vadd.f32 %v926_v58, %v768_v10  ;;  %v928_v30 = vpop.f32.mrb[47].mxu1  ;;  %1120 = vmatpush1.bf16.msra.mxu0 %v991_v26  ;;  %v959_v33 = vmax.f32 %v923_v27, 0.0 }
 0x243   : > { %v929_v28 = vadd.f32 %v928_v30, %v768_v10  ;;  %v960_v37 = vmax.f32 %v925_v7, 0.0 }
 0x244   : > { %v961_v35 = vmax.f32 %v927_v61, 0.0  ;;  %v1021_v61 = vpop.permute.xlu0 %1020 }
 0x245   : > { %v962_v42 = vmax.f32 %v929_v28, 0.0 }
 0x246   : > { %v993_v43 = vpack.c.bf16 %v961_v35, %v959_v33 }
 0x247   : > { %v994_v38 = vpack.c.bf16 %v962_v42, %v960_v37  ;;  %v1025_v37 = vpop.permute.xlu1 %1024 }
 0x249   : > { %1121 = vmatprep.subr.bf16.mxu0 %v994_v38 }
 0x24a   : > { %1122 = vmatpush1.bf16.msra.mxu0 %v993_v43 }
 0x24d   : > { %1140 = vmatmul.mubr.bf16.vlgmr.msra.gmra.mrb[16].mxu0 %v1544_v44 }
 0x24e   : > { %1149 = vmatprep.mubr.bf16.mxu0 %v1620_v4 }
 0x255   : > { %1150 = vmatmul.mubr.bf16.gmra.mrb[20].mxu0 %v1545_v45 }
 0x256   : > { %1159 = vmatprep.mubr.bf16.mxu0 %v1620_v4 }
 0x25d   : > { %1160 = vmatmul.mubr.bf16.gmra.mrb[24].mxu0 %v1546_v32 }
 0x25e   : > { %1169 = vmatprep.mubr.bf16.mxu0 %v1620_v4 }
 0x265   : > { %1170 = vmatmul.mubr.bf16.gmra.mrb[28].mxu0 %v1547_v46 }
 0x266   : > { %1179 = vmatprep.mubr.bf16.mxu0 %v1620_v4 }
 0x26d   : > { %1180 = vmatmul.mubr.bf16.gmra.mrb[32].mxu0 %v1548_v47 }
 0x26e   : > { %1189 = vmatprep.mubr.bf16.mxu0 %v1620_v4 }
 0x275   : > { %1190 = vmatmul.mubr.bf16.gmra.mrb[36].mxu0 %v1549_v48 }
 0x276   : > { %1199 = vmatprep.mubr.bf16.mxu0 %v1620_v4 }
 0x27d   : > { %1200 = vmatmul.mubr.bf16.gmra.mrb[40].mxu0 %v1550_v49 }
 0x27e   : > { %1209 = vmatprep.mubr.bf16.mxu0 %v1620_v4 }
 0x285   : > { %1210 = vmatmul.mubr.bf16.gmra.mrb[44].mxu0 %v1551_v11  ;;  %v1029_v11 = vpop.permute.xlu0 %1028 }
 0x320   : > { %v1141_v17 = vpop.f32.mrb[16].mxu0 }
 0x321   : > { %v1142_v50 = vadd.f32 %v1141_v17, %v997_v12  ;;  %v1143_v34 = vpop.f32.mrb[17].mxu0 }
 0x322   : > { %v1144_v51 = vadd.f32 %v1143_v34, %v997_v12  ;;  %v1145_v14 = vpop.f32.mrb[18].mxu0  ;;  %v1033_v34 = vpop.permute.xlu1 %1032 }
 0x323   : > { %v1146_v52 = vadd.f32 %v1145_v14, %v1001_v13  ;;  %v1147_v19 = vpop.f32.mrb[19].mxu0  ;;  %v1220_v54 = vmax.f32 %v1142_v50, 0.0 }
 0x324   : > { %v1148_v53 = vadd.f32 %v1147_v19, %v1001_v13  ;;  %v1221_v18 = vmax.f32 %v1144_v51, 0.0 }
 0x325   : > { %v1222_v55 = vmax.f32 %v1146_v52, 0.0 }
 0x326   : > { %v1223_v4 = vmax.f32 %v1148_v53, 0.0 }
 0x327   : > { %v1253_v23 = vpack.c.bf16 %v1222_v55, %v1220_v54 }
 0x328   : > { %v1254_v56 = vpack.c.bf16 %v1223_v4, %v1221_v18  ;;  %v1151_v57 = vpop.f32.mrb[20].mxu0 }
 0x329   : > { %v1152_v59 = vadd.f32 %v1151_v57, %v1005_v39  ;;  %v1153_v60 = vpop.f32.mrb[21].mxu0 }
 0x32a   : > { %v1154_v36 = vadd.f32 %v1153_v60, %v1005_v39  ;;  %v1155_v25 = vpop.f32.mrb[22].mxu0  ;;  %1271 = vmatprep.subr.bf16.mxu1 %v1254_v56 }
 0x32b   : > { %v1156_v62 = vadd.f32 %v1155_v25, %v1009_v20  ;;  %v1157_v63 = vpop.f32.mrb[23].mxu0  ;;  %1272 = vmatpush1.bf16.msra.mxu1 %v1253_v23  ;;  %v1224_v1 = vmax.f32 %v1152_v59, 0.0  ;;  %v1037_v23 = vpop.permute.xlu0 %1036 }
 0x32c   : > { %v1158_v0 = vadd.f32 %v1157_v63, %v1009_v20  ;;  %v1225_v3 = vmax.f32 %v1154_v36, 0.0  ;;  %v1041_v20 = vpop.permute.xlu1 %1040 }
 0x32d   : > { %v1226_v2 = vmax.f32 %v1156_v62, 0.0 }
 0x32e   : > { %v1227_v5 = vmax.f32 %v1158_v0, 0.0 }
 0x32f   : > { %v1255_v24 = vpack.c.bf16 %v1226_v2, %v1224_v1 }
 0x330   : > { %v1256_v6 = vpack.c.bf16 %v1227_v5, %v1225_v3  ;;  %v1161_v8 = vpop.f32.mrb[24].mxu0 }
 0x331   : > { %v1162_v9 = vadd.f32 %v1161_v8, %v1013_v29  ;;  %v1163_v40 = vpop.f32.mrb[25].mxu0 }
 0x332   : > { %v1164_v16 = vadd.f32 %v1163_v40, %v1013_v29  ;;  %v1165_v26 = vpop.f32.mrb[26].mxu0  ;;  %1273 = vmatprep.subr.bf16.mxu1 %v1256_v6  ;;  %v1045_v29 = vpop.permute.xlu0 %1044 }
 0x333   : > { %v1166_v21 = vadd.f32 %v1165_v26, %v1017_v15  ;;  %v1167_v31 = vpop.f32.mrb[27].mxu0  ;;  %1274 = vmatpush1.bf16.msra.mxu1 %v1255_v24  ;;  %v1228_v27 = vmax.f32 %v1162_v9, 0.0 }
 0x334   : > { %v1168_v22 = vadd.f32 %v1167_v31, %v1017_v15  ;;  %v1229_v10 = vmax.f32 %v1164_v16, 0.0  ;;  %v1049_v15 = vpop.permute.xlu1 %1048 }
 0x335   : > { %v1230_v41 = vmax.f32 %v1166_v21, 0.0 }
 0x336   : > { %v1231_v7 = vmax.f32 %v1168_v22, 0.0 }
 0x337   : > { %v1257_v58 = vpack.c.bf16 %v1230_v41, %v1228_v27 }
 0x338   : > { %v1258_v30 = vpack.c.bf16 %v1231_v7, %v1229_v10  ;;  %v1171_v28 = vpop.f32.mrb[28].mxu0 }
 0x339   : > { %v1172_v33 = vadd.f32 %v1171_v28, %v1021_v61  ;;  %v1173_v35 = vpop.f32.mrb[29].mxu0 }
 0x33a   : > { %v1174_v42 = vadd.f32 %v1173_v35, %v1021_v61  ;;  %v1175_v43 = vpop.f32.mrb[30].mxu0  ;;  %1275 = vmatprep.subr.bf16.mxu1 %v1258_v30  ;;  %v1053_v61 = vpop.permute.xlu0 %1052 }
 0x33b   : > { %v1176_v38 = vadd.f32 %v1175_v43, %v1025_v37  ;;  %v1177_v44 = vpop.f32.mrb[31].mxu0  ;;  %1276 = vmatpush1.bf16.msra.mxu1 %v1257_v58  ;;  %v1232_v32 = vmax.f32 %v1172_v33, 0.0 }
 0x33c   : > { %v1178_v45 = vadd.f32 %v1177_v44, %v1025_v37  ;;  %v1233_v47 = vmax.f32 %v1174_v42, 0.0  ;;  %v1057_v37 = vpop.permute.xlu1 %1056 }
 0x33d   : > { %v1234_v46 = vmax.f32 %v1176_v38, 0.0 }
 0x33e   : > { %v1235_v48 = vmax.f32 %v1178_v45, 0.0 }
 0x33f   : > { %v1259_v49 = vpack.c.bf16 %v1234_v46, %v1232_v32 }
 0x340   : > { %v1260_v12 = vpack.c.bf16 %v1235_v48, %v1233_v47  ;;  %v1181_v13 = vpop.f32.mrb[32].mxu0 }
 0x341   : > { %v1182_v17 = vadd.f32 %v1181_v13, %v1029_v11  ;;  %v1183_v50 = vpop.f32.mrb[33].mxu0  ;;  %v1270_v13 = vstv %s1269_s22 }
 0x342   : > { %v1184_v51 = vadd.f32 %v1183_v50, %v1029_v11  ;;  %v1185_v14 = vpop.f32.mrb[34].mxu0  ;;  %1277 = vmatprep.subr.bf16.mxu1 %v1260_v12  ;;  %v1252_v12 = vld [vmem:[%s2053_s5] sm:$0x1] }
 0x343   : > { %v1186_v52 = vadd.f32 %v1185_v14, %v1033_v34  ;;  %v1187_v19 = vpop.f32.mrb[35].mxu0  ;;  %1278 = vmatpush1.bf16.msra.mxu1 %v1259_v49  ;;  %v1236_v53 = vmax.f32 %v1182_v17, 0.0 }
 0x344   : > { %v1188_v39 = vadd.f32 %v1187_v19, %v1033_v34  ;;  %v1237_v55 = vmax.f32 %v1184_v51, 0.0  ;;  %v1623_v19 = vmov 1966171168  }
 0x345   : > { %v1238_v54 = vmax.f32 %v1186_v52, 0.0 }
 0x346   : > { %v1239_v18 = vmax.f32 %v1188_v39, 0.0  ;;  %v1318_v39 = vunpack.c.l.s4 %v1623_v19 }
 0x347   : > { %v1261_v4 = vpack.c.bf16 %v1238_v54, %v1236_v53  ;;  %v1320_v53 = vlaneseq }
 0x348   : > { %v1262_v56 = vpack.c.bf16 %v1239_v18, %v1237_v55  ;;  %v1191_v57 = vpop.f32.mrb[36].mxu0  ;;  %v1319_v54 = vunpack.c.0.s8 %v1318_v39 }
 0x349   : > { %v1192_v59 = vadd.f32 %v1191_v57, %v1037_v23  ;;  %v1193_v60 = vpop.f32.mrb[37].mxu0  ;;  %v1321_v55 = vshrl.u32 %v1320_v53, 7  ;;  %vm1334_vm1 = vcmp.lt.s32.totalorder %v1320_v53, 256 }
 0x34a   : > { %v1194_v36 = vadd.f32 %v1193_v60, %v1037_v23  ;;  %v1195_v25 = vpop.f32.mrb[38].mxu0  ;;  %1279 = vmatprep.subr.bf16.mxu1 %v1262_v56 }
 0x34b   : > { %v1196_v62 = vadd.f32 %v1195_v25, %v1041_v20  ;;  %v1197_v63 = vpop.f32.mrb[39].mxu0  ;;  %1280 = vmatpush1.bf16.msra.mxu1 %v1261_v4  ;;  %v1240_v1 = vmax.f32 %v1192_v59, 0.0  ;;  %v1322_v4 = vsub.s32 %v1319_v54, %v1321_v55 }
 0x34c   : > { %v1198_v0 = vadd.f32 %v1197_v63, %v1041_v20  ;;  %v1241_v3 = vmax.f32 %v1194_v36, 0.0 }
 0x34d   : > { %v1242_v2 = vmax.f32 %v1196_v62, 0.0 }
 0x34e   : > { %v1243_v5 = vmax.f32 %v1198_v0, 0.0 }
 0x34f   : > { %v1263_v24 = vpack.c.bf16 %v1242_v2, %v1240_v1 }
 0x350   : > { %v1264_v6 = vpack.c.bf16 %v1243_v5, %v1241_v3  ;;  %v1201_v8 = vpop.f32.mrb[40].mxu0 }
 0x351   : > { %v1202_v9 = vadd.f32 %v1201_v8, %v1045_v29  ;;  %v1203_v40 = vpop.f32.mrb[41].mxu0 }
 0x352   : > { %v1204_v16 = vadd.f32 %v1203_v40, %v1045_v29  ;;  %v1205_v26 = vpop.f32.mrb[42].mxu0  ;;  %1281 = vmatprep.subr.bf16.mxu1 %v1264_v6 }
 0x353   : > { %v1206_v21 = vadd.f32 %v1205_v26, %v1049_v15  ;;  %v1207_v31 = vpop.f32.mrb[43].mxu0  ;;  %1282 = vmatpush1.bf16.msra.mxu1 %v1263_v24  ;;  %v1244_v27 = vmax.f32 %v1202_v9, 0.0 }
 0x354   : > { %v1208_v22 = vadd.f32 %v1207_v31, %v1049_v15  ;;  %v1245_v10 = vmax.f32 %v1204_v16, 0.0 }
 0x355   : > { %v1246_v41 = vmax.f32 %v1206_v21, 0.0 }
 0x356   : > { %v1247_v7 = vmax.f32 %v1208_v22, 0.0 }
 0x357   : > { %v1265_v58 = vpack.c.bf16 %v1246_v41, %v1244_v27 }
 0x358   : > { %v1266_v30 = vpack.c.bf16 %v1247_v7, %v1245_v10  ;;  %v1211_v28 = vpop.f32.mrb[44].mxu0 }
 0x359   : > { %v1212_v33 = vadd.f32 %v1211_v28, %v1053_v61  ;;  %v1213_v35 = vpop.f32.mrb[45].mxu0 }
 0x35a   : > { %v1214_v42 = vadd.f32 %v1213_v35, %v1053_v61  ;;  %v1215_v43 = vpop.f32.mrb[46].mxu0  ;;  %1283 = vmatprep.subr.bf16.mxu1 %v1266_v30 }
 0x35b   : > { %v1216_v38 = vadd.f32 %v1215_v43, %v1057_v37  ;;  %v1217_v44 = vpop.f32.mrb[47].mxu0  ;;  %1284 = vmatpush1.bf16.msra.mxu1 %v1265_v58  ;;  %v1248_v32 = vmax.f32 %v1212_v33, 0.0 }
 0x35c   : > { %v1218_v45 = vadd.f32 %v1217_v44, %v1057_v37  ;;  %v1249_v47 = vmax.f32 %v1214_v42, 0.0 }
 0x35d   : > { %v1250_v46 = vmax.f32 %v1216_v38, 0.0 }
 0x35e   : > { %v1251_v48 = vmax.f32 %v1218_v45, 0.0 }
 0x35f   : > { %v1267_v49 = vpack.c.bf16 %v1250_v46, %v1248_v32 }
 0x360   : > { %v1268_v11 = vpack.c.bf16 %v1251_v48, %v1249_v47 }
 0x362   : > { %1285 = vmatprep.subr.bf16.mxu1 %v1268_v11 }
 0x363   : > { %1286 = vmatpush1.bf16.msra.mxu1 %v1267_v49 }
 0x366   : > { %1304 = vmatmul.mubr.bf16.vlgmr.msra.gmra.mrb[48].mxu1 %v1252_v12 }
 0x439   : > { %v1305_v17 = vpop.f32.mrb[48].mxu1 }
 0x43a   : > { %v1306_v50 = vadd.f32 %v1305_v17, %v1270_v13  ;;  %v1307_v34 = vpop.f32.mrb[49].mxu1 }
 0x43b   : > { %v1308_v51 = vadd.f32 %v1307_v34, %v1270_v13  ;;  %v1309_v14 = vpop.f32.mrb[50].mxu1 }
 0x43c   : > { %1552 = vtanh.f32 %v1306_v50  ;;  %v1310_v52 = vpop.f32.mrb[51].mxu1 }
 0x43d   : > { %1554 = vtanh.f32 %v1308_v51 }
 0x446   : > { %v1553_v18 = vpop.eup %1552 }
 0x447   : > { %v1555_v23 = vpop.eup %1554 }
 0x448   : > { %v1316_v56 = vcombine.low %v1553_v18, %v1555_v23 }
 0x44a   : > { %v1323_v57 = vrot.slane %v1316_v56, %v1322_v4 }
 0x44c   : > { %v1330_v59 = vrot.slane %v1323_v57, %v1322_v4 }
 0x44e   : > { %1336 = vst.msk [vmem:[%s324_s25] sm:$0x3] %vm1334_vm1, %v1330_v59 }
 0x44f   : > { %1569 = shalt.err (!%p1566_p5)
}
 0x450   : > { %s1570_s21 = scalar_lea.hbm %s2004_s14, 32  ;;  %s1574_s22 = scalar_lea.hbm %s2055_s7, 64 }
 0x451   : > { %p1571_p7 = scmp.ne.s32.totalorder %s2004_s14, %s1570_s21  ;;  %p1575_p12 = scmp.lt.u32.totalorder %s2004_s14, %s2055_s7 }
 0x452   : > { %p1576_p13 = scmp.lt.u32.totalorder %s1574_s22, %s1570_s21  ;;  %p1578_p1 = scmp.lt.u32.totalorder %s1570_s21, %s2004_s14 }
 0x453   : > { %p1572_p10 = pnand %p1571_p7, %p1706_p6 }
 0x454   : > { %p1577_p0 = por %p1576_p13, %p1575_p12 }
 0x455   : > { %p1573_p11 = pneg %p1572_p10 }
 0x456   : > { %p1579_p2 = por %p1578_p1, %p1577_p0 }
 0x458   : > { %p1580_p3 = pnand %p1579_p2, %p1573_p11 }
 0x45a   : > { %1583 = shalt.err (!%p1580_p3)
}
 0x45b   : > { %1473 = dma.vmem_to_hbm [thread:$0]  (%p1706_p6), %s2006_s30, 32, %s2004_s14, %s1338_s15  }
 0x45c PF: > { %s1364_s25 = sand.u32 1, %s1606_s26   ;;  %p1476_p4 = pnand %p1419_p9, %p1710_p8 }
 0x45d   : > { %s1365_s9 = scalar_lea.sflag [#allocation5], %s1364_s25 }
 0x45e   : > { %1601 = dma.done.wait (!%p1476_p4), %s1365_s9, 32  }
 0x45f   : > { %1603 = vsyncadd (!%p1476_p4), %s1365_s9, 4294967264  ;;  %p18_p5 = scmp.ge.s32.totalorder %s1691_s8, 4   ;;  %s2058_s26 = smov %s1610_s27 }
 0x460   : > { %s2059_s27 = smov %s1614_s28  ;;  %s2060_s28 = smov %s1704_s11 }
 0x461   : > { %s2061_s29 = smov %s1691_s8  ;;  %20 = sbr.rel (!%p18_p5) target bundleno = 5 (0x5), region = 126 }
 0x468   :  { %1370 = vsyncpa [#allocation5], 1 }
 0x469   :  { %1372 = vsyncpa [#allocation5 + $0x1], 1 }

</bundles_post_ra>
